<compile_context>
chip_gen: v6e
topology: v6e:2x2x1
jax: 0.10.0
libtpu: 0.0.40
codegen_flags: <defaults>
</compile_context>

<pallas_src>
import functools
import math

import jax
import jax.numpy as jnp
from jax.experimental import pallas as pl
from jax.experimental.pallas import tpu as pltpu


# ------------------------------ Pallas kernel ------------------------------

def _maxout_kernel(x_ref, w_ref, b_ref, o_ref, *, pool, bn):
    # x_ref : (bm, Kp)          bf16 row tile of the (flattened, K-padded) input
    # w_ref : (Kp, pool*bn)     bf16 weight slab for this N-tile; cols
    #                           [p*bn:(p+1)*bn] hold pool group p (lane aligned)
    # b_ref : (1, pool*bn)      f32 bias, same column layout
    # o_ref : (bm, bn)          lane-dense output tile
    y = jnp.dot(x_ref[...], w_ref[...], preferred_element_type=jnp.float32)
    y = y + b_ref[...]
    acc = y[:, 0:bn]
    for p in range(1, pool):          # pool is a small static int; unrolled
        acc = jnp.maximum(acc, y[:, p * bn:(p + 1) * bn])
    o_ref[...] = acc.astype(o_ref.dtype)


# ------------------------------ helpers ------------------------------

def _round_up(n, m):
    return ((n + m - 1) // m) * m


def _pick_block_n(Kp, N, pool, weight_itemsize):
    """Full-N blocks unless the (Kp, pool*N) slab would crowd VMEM (v7x: 64 MiB/TC)."""
    if N % 128 != 0:
        return N  # keep the block equal to the full dim (still a legal layout)
    budget = 24 * 1024 * 1024  # slab budget incl. double buffering
    for bn in range(N, 127, -128):
        if N % bn == 0 and 2 * Kp * pool * bn * weight_itemsize <= budget:
            return bn
    return 128


def prepare_maxout_params(w_torch, b_torch, output_size, pool_size,
                          *, k_pad_to=128, block_n=None,
                          weight_dtype=jnp.bfloat16):
    """Regroup torch-layout Linear params ONCE (hoisted out of any hot loop).

    torch Linear weight: (output_size * pool_size, input_size), row j = o*pool + p.
    Returns kernel-ready arrays plus a meta dict:
      w_kernel: (Kp, NT*pool*bn)  bf16, column j*(pool*bn) + p*bn + c holds the
                weight for output column j*bn + c, pool group p.
      b_kernel: (1,  NT*pool*bn)  f32, same column layout.
    """
    out_pool, K = w_torch.shape
    assert out_pool == output_size * pool_size
    N, pool = output_size, pool_size
    Kp = _round_up(K, k_pad_to)
    w_itemsize = jnp.dtype(weight_dtype).itemsize
    if block_n is None:
        block_n = _pick_block_n(Kp, N, pool, w_itemsize)
    assert N % block_n == 0
    NT = N // block_n

    # (out*pool, K) -> (pool, K, N) with [p, k, o] = w_torch[o*pool + p, k]
    w_g = jnp.asarray(w_torch, jnp.float32).reshape(N, pool, K).transpose(1, 2, 0)
    if Kp != K:
        w_g = jnp.pad(w_g, ((0, 0), (0, Kp - K), (0, 0)))
    # -> (Kp, NT, pool, bn) -> (Kp, NT*pool*bn)
    w_kernel = (w_g.reshape(pool, Kp, NT, block_n)
                   .transpose(1, 2, 0, 3)
                   .reshape(Kp, NT * pool * block_n)
                   .astype(weight_dtype))

    b_g = jnp.asarray(b_torch, jnp.float32).reshape(N, pool).T        # (pool, N)
    b_kernel = (b_g.reshape(pool, NT, block_n)
                   .transpose(1, 0, 2)
                   .reshape(1, NT * pool * block_n))                  # f32

    meta = dict(K=K, Kp=Kp, N=N, pool=pool, block_n=block_n)
    return w_kernel, b_kernel, meta


# ------------------------------ wrapper ------------------------------

def maxout_forward(x, w_kernel, b_kernel, meta, *, block_m=512,
                   out_dtype=jnp.float32):
    """Maxout forward. x: (..., K); params from prepare_maxout_params."""
    K, Kp, N = meta["K"], meta["Kp"], meta["N"]
    pool, bn = meta["pool"], meta["block_n"]

    orig_lead = x.shape[:-1]
    assert x.shape[-1] == K
    M = int(math.prod(orig_lead)) if orig_lead else 1

    x2 = x.reshape(M, K)
    if Kp != K:
        x2 = jnp.pad(x2, ((0, 0), (0, Kp - K)))
    x2 = x2.astype(w_kernel.dtype)                    # bf16 feed to the MXU

    # Row tile: large (amortize per-step pipeline overhead), multiple of 8.
    bm = min(block_m, _round_up(M, 8))
    # v7x: prefer >=2 row tiles so the 'parallel' axis uses both TensorCores.
    if M >= 16 and _round_up(M, bm) // bm < 2:
        bm = _round_up(-(-M // 2), 8)
    Mp = _round_up(M, bm)
    if Mp != M:
        x2 = jnp.pad(x2, ((0, Mp - M), (0, 0)))

    n_row_tiles = Mp // bm
    n_col_tiles = N // bn
    grid = (n_row_tiles, n_col_tiles)

    out_itemsize = jnp.dtype(out_dtype).itemsize
    w_itemsize = jnp.dtype(w_kernel.dtype).itemsize

    # VMEM: double-buffered footprint with 2x headroom, capped at 48 MiB (v7x
    # only has 64 MiB/TC -- leave room for compiler scratch).
    need = 2 * (bm * Kp * 2 + Kp * pool * bn * w_itemsize
                + pool * bn * 4 + bm * bn * out_itemsize)
    vmem_limit = int(min(48 * 1024 * 1024, max(4 * 1024 * 1024, 2 * need)))

    flops = 2 * Mp * Kp * pool * N
    bytes_accessed = (n_col_tiles * Mp * Kp * 2          # x (re-read per N tile)
                      + n_row_tiles * Kp * pool * N * w_itemsize
                      + pool * N * 4
                      + Mp * N * out_itemsize)

    out = pl.pallas_call(
        functools.partial(_maxout_kernel, pool=pool, bn=bn),
        grid=grid,
        in_specs=[
            pl.BlockSpec((bm, Kp), lambda i, j: (i, 0)),            # x row tile
            pl.BlockSpec((Kp, pool * bn), lambda i, j: (0, j)),     # weight slab
            pl.BlockSpec((1, pool * bn), lambda i, j: (0, j)),      # bias
        ],
        out_specs=pl.BlockSpec((bm, bn), lambda i, j: (i, j)),
        out_shape=jax.ShapeDtypeStruct((Mp, N), out_dtype),
        compiler_params=pltpu.CompilerParams(
            dimension_semantics=("parallel", "parallel"),
            vmem_limit_bytes=vmem_limit,
        ),
        cost_estimate=pl.CostEstimate(
            flops=flops, transcendentals=0, bytes_accessed=bytes_accessed),
    )(x2, w_kernel, b_kernel)

    out = out[:M]
    return out.reshape(*orig_lead, N)


# ------------------------------ main ------------------------------

if __name__ == "__main__":
    # Small shapes consistent with the module (any leading dims, last dim = input_size).
    input_size, output_size, pool_size = 96, 128, 4
    B, T = 2, 16

    key = jax.random.PRNGKey(0)
    kx, kw, kb = jax.random.split(key, 3)
    x = jax.random.normal(kx, (B, T, input_size), jnp.float32)
    # torch-layout nn.Linear(input_size, output_size * pool_size) parameters.
    w_torch = jax.random.normal(kw, (output_size * pool_size, input_size),
                                jnp.float32) * 0.05
    b_torch = jax.random.normal(kb, (output_size * pool_size,), jnp.float32) * 0.05

    # Hoisted, one-time weight/bias regroup + K padding + bf16 cast.
    w_kernel, b_kernel, meta = prepare_maxout_params(
        w_torch, b_torch, output_size, pool_size)

    out = maxout_forward(x, w_kernel, b_kernel, meta)
    out = jax.block_until_ready(out)

    # Pure-JAX reference reproducing the PyTorch Maxout forward exactly (f32).
    y_ref = x.reshape(-1, input_size) @ w_torch.T + b_torch
    y_ref = y_ref.reshape(B, T, output_size, pool_size).max(axis=-1)

    assert out.shape == (B, T, output_size), out.shape
    assert jnp.all(jnp.isfinite(out))
    # bf16 operands (f32 accumulation) -> loosened tolerance vs the f32 reference.
    assert jnp.allclose(out, y_ref, atol=2e-2, rtol=2e-2), float(
        jnp.max(jnp.abs(out - y_ref)))
    print("KERNEL_OK")
</pallas_src>

<mosaic_0001>
module attributes {stable_mosaic.version = 11 : i64} {
  func.func @_maxout_kernel(%arg0: i32, %arg1: i32, %arg2: memref<16x128xbf16, #tpu.memory_space<vmem>>, %arg3: memref<128x512xbf16, #tpu.memory_space<vmem>>, %arg4: memref<1x512xf32, #tpu.memory_space<vmem>>, %arg5: memref<16x128xf32, #tpu.memory_space<vmem>>) attributes {dimension_semantics = [#tpu.dimension_semantics<parallel>, #tpu.dimension_semantics<parallel>], iteration_bounds = array<i64: 2, 1>, scalar_prefetch = 0 : i64, scratch_operands = 0 : i64, tpu.core_type = #tpu.core_type<tc>, window_params = [{transform_indices = @transform_0, window_bounds = array<i64: 16, 128>}, {transform_indices = @transform_1, window_bounds = array<i64: 128, 512>}, {transform_indices = @transform_2, window_bounds = array<i64: 1, 512>}, {transform_indices = @transform_3, window_bounds = array<i64: 16, 128>}]} {
    %c0 = arith.constant 0 : index
    %c0_0 = arith.constant 0 : index
    %0 = vector.load %arg2[%c0, %c0_0] : memref<16x128xbf16, #tpu.memory_space<vmem>>, vector<16x128xbf16>
    %c0_1 = arith.constant 0 : index
    %c0_2 = arith.constant 0 : index
    %1 = vector.load %arg3[%c0_1, %c0_2] : memref<128x512xbf16, #tpu.memory_space<vmem>>, vector<128x512xbf16>
    %cst = arith.constant dense<0.000000e+00> : vector<16x512xf32>
    %2 = tpu.matmul %0, %1, %cst {dimension_numbers = #tpu.dot_dimension_numbers<[1], [0], [0], [1], [0, 0, 1, 1], [], []>} : vector<16x128xbf16>, vector<128x512xbf16>, vector<16x512xf32> -> vector<16x512xf32>
    %c0_3 = arith.constant 0 : index
    %c0_4 = arith.constant 0 : index
    %3 = vector.load %arg4[%c0_3, %c0_4] : memref<1x512xf32, #tpu.memory_space<vmem>>, vector<1x512xf32>
    %4 = vector.broadcast %3 : vector<1x512xf32> to vector<16x512xf32>
    %5 = arith.addf %2, %4 : vector<16x512xf32>
    %6 = vector.extract_strided_slice %5 {offsets = [0, 0], sizes = [16, 128], strides = [1, 1]} : vector<16x512xf32> to vector<16x128xf32>
    %7 = vector.extract_strided_slice %5 {offsets = [0, 128], sizes = [16, 128], strides = [1, 1]} : vector<16x512xf32> to vector<16x128xf32>
    %8 = arith.maximumf %6, %7 : vector<16x128xf32>
    %9 = vector.extract_strided_slice %5 {offsets = [0, 256], sizes = [16, 128], strides = [1, 1]} : vector<16x512xf32> to vector<16x128xf32>
    %10 = arith.maximumf %8, %9 : vector<16x128xf32>
    %11 = vector.extract_strided_slice %5 {offsets = [0, 384], sizes = [16, 128], strides = [1, 1]} : vector<16x512xf32> to vector<16x128xf32>
    %12 = arith.maximumf %10, %11 : vector<16x128xf32>
    %c0_5 = arith.constant 0 : index
    %c0_6 = arith.constant 0 : index
    %13 = vector.load %arg5[%c0_5, %c0_6] : memref<16x128xf32, #tpu.memory_space<vmem>>, vector<16x128xf32>
    tpu.vector_store %arg5[%c0_5, %c0_6], %12 {strides = array<i32>} : memref<16x128xf32, #tpu.memory_space<vmem>>, vector<16x128xf32>,
    return
  }
  func.func @transform_0(%arg0: i32, %arg1: i32) -> (i32, i32) {
    %c0_i32 = arith.constant 0 : i32
    %c0_i32_0 = arith.constant 0 : i32
    return %arg0, %c0_i32 : i32, i32
  }
  func.func @transform_1(%arg0: i32, %arg1: i32) -> (i32, i32) {
    %c0_i32 = arith.constant 0 : i32
    %c0_i32_0 = arith.constant 0 : i32
    return %c0_i32, %arg1 : i32, i32
  }
  func.func @transform_2(%arg0: i32, %arg1: i32) -> (i32, i32) {
    %c0_i32 = arith.constant 0 : i32
    %c0_i32_0 = arith.constant 0 : i32
    return %c0_i32, %arg1 : i32, i32
  }
  func.func @transform_3(%arg0: i32, %arg1: i32) -> (i32, i32) {
    %c0_i32 = arith.constant 0 : i32
    return %arg0, %arg1 : i32, i32
  }
}

</mosaic_0001>

<bundles_post_ra>
// kernel: tpu_custom_call.1
= control target key start
LH: loop header
LB: loop body
LE: loop exit
PB: predicated region body
PF: predicated region fallthrough
CT: control target
= control target key end

     0   :  { %8 = vsyncpa [#allocation3], 0  ;;  %s1270_s0 = inlined_call_operand.hbm [shape: bf16[32,128], index: 0, kind: input, shape index: {}]   ;;  %s1271_s1 = inlined_call_operand.hbm [shape: bf16[128,512], index: 1, kind: input, shape index: {}]   ;;  %s1272_s2 = inlined_call_operand.hbm [shape: f32[1,512], index: 2, kind: input, shape index: {}]   ;;  %s1273_s3 = inlined_call_operand.hbm [shape: f32[32,128], index: 3, kind: output, shape index: {}]  }
   0x1   :  { %10 = vsyncpa [#allocation3 + $0x1], 0 }
   0x2   :  { %11 = vsyncpa [#allocation6], 0 }
   0x3   :  { %12 = vsyncpa [#allocation4], 0 }
   0x4   :  { %14 = vsyncpa [#allocation4 + $0x1], 0  ;;  %s1078_s12 = smov 0   ;;  %s1080_s13 = smov 0  }
   0x5   :  { %s1082_s14 = smov 0   ;;  %s1084_s15 = smov 0  }
   0x6   :  { %s1086_s16 = smov 0   ;;  %s1088_s17 = smov 0  }
   0x7 LB: > { %s688_s18 = sadd.s32 4294967295, %s1045_s17   ;;  %s689_s19 = sadd.s32 4294967294, %s1045_s17   ;;  %s1045_s17 = sphi %s1088_s17, %s20_s17   ;;  %s1041_s16 = sphi %s1086_s16, %s1293_s16   ;;  %s1037_s15 = sphi %s1084_s15, %s1292_s15   ;;  %s1033_s14 = sphi %s1082_s14, %s1291_s14   ;;  %s1029_s13 = sphi %s1080_s13, %s1290_s13   ;;  %s1025_s12 = sphi %s1078_s12, %s1289_s12  }
   0x8   : > { %p52_p0 = scmp.ne.s32.totalorder %s1029_s13, %s1025_s12  ;;  %p1112_p1 = scmp.eq.s32.totalorder %s688_s18, 0 }
   0x9   : > { %p1116_p2 = scmp.eq.s32.totalorder %s688_s18, 1  ;;  %p136_p3 = scmp.eq.s32.totalorder %s689_s19, 1 }
   0xa   : > { %s1277_s20 = scalar_select %p1112_p1, 1, 0 }
   0xb   : > { %p1122_p4 = por %p1112_p1, %p52_p0  ;;  %p690_p5 = scmp.ge.s32.totalorder %s1045_s17, 1 }
   0xc   : > { %p1127_p6 = por %p136_p3, %p52_p0  ;;  %p143_p7 = scmp.lt.s32.totalorder %s1045_s17, 3 }
   0xd   : > { %s1279_s22 = scalar_select %p1122_p4, 1, 0 }
   0xe   : > { %s1280_s23 = scalar_select %p1127_p6, 1, 0 }
   0xf   : > { %p1132_p8 = pnand %p690_p5, %p143_p7  ;;  %s1047_s25 = smov [#allocation5]  }
  0x10   : > { %s158_s26 = sshll.u32 %s1047_s25, 4  ;;  %s1048_s28 = smov [#allocation7]   ;;  %s159_s26 = int_to_ptr.vmem [resolvable:$true] %s158_s26 }
  0x11   : > { %p754_p9 = pneg %p1132_p8  ;;  %s175_s29 = sshll.u32 %s1048_s28, 4  ;;  %s176_s29 = int_to_ptr.vmem [resolvable:$true] %s175_s29 }
  0x12   : > { %s892_s30 = scalar_lea.vmem %s159_s26, 4096  ;;  %p900_p5 = scmp.lt.s32.totalorder %s159_s26, %s159_s26 }
  0x13   : > { %p1141_p11 = pnand %p754_p9, %p1112_p1  ;;  %p893_p13 = scmp.ne.s32.totalorder %s159_s26, %s892_s30 }
  0x14   : > { %p901_p7 = scmp.lt.s32.totalorder %s892_s30, %s892_s30 }
  0x15   : > { %p883_p12 = pneg %p1141_p11 }
  0x16   : > { %p902_p10 = por %p901_p7, %p900_p5 }
  0x17   : > { %p895_p0 = pnand %p893_p13, %p883_p12 }
  0x19   : > { %p896_p3 = pneg %p895_p0 }
  0x1b   : > { %p903_p9 = pnand %p902_p10, %p896_p3 }
  0x1d   : > { %906 = shalt.err (!%p903_p9)
}
  0x1e   : > { %s1049_s4 = smov 256   ;;  %s1050_s5 = smov 16  }
  0x1f   : > { %757 = dma.hbm_to_vmem [thread:$0]  (!%p1141_p11), %s1271_s1, 4096, %s159_s26, [#allocation6], %s1049_s4, %s1049_s4, %s1050_s5  }
  0x20   : > { %s918_s8 = scalar_lea.vmem %s176_s29, 64  ;;  %p926_p1 = scmp.lt.s32.totalorder %s176_s29, %s176_s29 }
  0x21   : > { %p919_p6 = scmp.ne.s32.totalorder %s176_s29, %s918_s8  ;;  %p927_p4 = scmp.lt.s32.totalorder %s918_s8, %s918_s8 }
  0x23   : > { %p921_p13 = pnand %p919_p6, %p883_p12  ;;  %p928_p5 = por %p927_p4, %p926_p1 }
  0x25   : > { %p922_p0 = pneg %p921_p13 }
  0x27   : > { %p929_p10 = pnand %p928_p5, %p922_p0 }
  0x29   : > { %932 = shalt.err (!%p929_p10)
}
  0x2a   : > { %760 = dma.hbm_to_vmem [thread:$0]  (!%p1141_p11), %s1272_s2, 64, %s176_s29, [#allocation6]  }
  0x2b   : > { %s32_s11 = sadd.s32 1, %s1041_s16  ;;  %s39_s18 = sadd.s32 1, %s1033_s14 }
  0x2c   : > { %p34_p1 = scmp.ge.s32.totalorder %s32_s11, 2  ;;  %p46_p4 = scmp.ne.s32.totalorder %s1033_s14, %s1029_s13 }
  0x2d   : > { %p47_p6 = scmp.eq.s32.totalorder %s1045_s17, 0  ;;  %p771_p12 = scmp.lt.s32.totalorder %s1045_s17, 2 }
  0x2e   : > { %s1295_s11 = smov (%p34_p1, %s32_s11), 0  ;;  %p1173_p7 = por %p1116_p2, %p46_p4 }
  0x2f   : > { %p48_p3 = por %p47_p6, %p46_p4  ;;  %s36_s25 = ssub.s32 %s1041_s16, %s1295_s11 }
  0x30   : > { %s186_s26 = sand.u32 1, %s1033_s14   ;;  %p37_p9 = scmp.eq.s32.totalorder %s36_s25, 0 }
  0x31   : > { %s694_s27 = sshll.u32 %s186_s26, 3  ;;  %s740_s28 = sshll.u32 %s1041_s16, 7 }
  0x32   : > { %s1182_s29 = scalar_select %p37_p9, %s1033_s14, %s39_s18  }
  0x33   : > { %s196_s5 = scalar_lea.hbm %s1270_s0, %s740_s28  ;;  %s190_s6 = scalar_lea.vmem [#allocation2], %s694_s27 }
  0x34   : > { %s197_s7 = sshll.u32 %s190_s6, 4  ;;  %p1189_p11 = pnand %p771_p12, %p48_p3  ;;  %s198_s7 = int_to_ptr.vmem [resolvable:$true] %s197_s7 }
  0x35   : > { %s187_s8 = scalar_lea.sflag [#allocation3], %s186_s26  ;;  %s946_s9 = scalar_lea.vmem %s198_s7, 128 }
  0x36   : > { %p935_p2 = pneg %p1189_p11  ;;  %p947_p13 = scmp.ne.s32.totalorder %s198_s7, %s946_s9 }
  0x37   : > { %s1051_s10 = smov [#allocation2]  }
  0x38   : > { %p949_p0 = pnand %p947_p13, %p935_p2  ;;  %s951_s18 = sshll.u32 %s1051_s10, 4  ;;  %s952_s18 = int_to_ptr.vmem [resolvable:$false] %s951_s18 }
  0x39   : > { %s953_s25 = scalar_lea.vmem %s952_s18, 256  ;;  %p954_p10 = scmp.lt.s32.totalorder %s198_s7, %s952_s18 }
  0x3a   : > { %p950_p5 = pneg %p949_p0  ;;  %p955_p1 = scmp.lt.s32.totalorder %s953_s25, %s946_s9 }
  0x3c   : > { %p956_p4 = por %p955_p1, %p954_p10 }
  0x3e   : > { %p957_p6 = pnand %p956_p4, %p950_p5 }
  0x40   : > { %960 = shalt.err (!%p957_p6)
}
  0x41   : > { %s1052_s27 = smov 64   ;;  %s1053_s28 = smov 4  }
  0x42   : > { %764 = dma.hbm_to_vmem [thread:$0]  (!%p1189_p11), %s196_s5, 128, %s198_s7, %s187_s8, %s1052_s27, %s1052_s27, %s1053_s28  }
  0x43   : > { %209 = sbr.rel (%p1132_p8) target bundleno = 331 (0x14b), region = 32  ;;  %s1200_s26 = sand.u32 (!%p1132_p8), 1, %s1029_s13  }
  0x44   : > { %s698_s30 = sshll.u32 (!%p1132_p8), %s1200_s26, 3  ;;  %s212_s4 = scalar_lea.sflag (!%p1132_p8), [#allocation3], %s1200_s26 }
  0x45   : > { %s1204_s6 = scalar_lea.vmem (!%p1132_p8), [#allocation2], %s698_s30  ;;  %p1285_p12 = scmp.ne.s32.totalorder (!%p1132_p8), %s1279_s22, 0 }
  0x48   : > { %1012 = dma.done.wait (%p1285_p12), %s212_s4, 128  }
  0x49   : > { %1014 = vsyncadd (%p1285_p12), %s212_s4, 4294967168  ;;  %p1286_p3 = scmp.ne.s32.totalorder %s1277_s20, 0 }
  0x4b   : > { %1016 = dma.done.wait (%p1286_p3), [#allocation6], 4160  }
  0x4c   : > { %1018 = vsyncadd (%p1286_p3), [#allocation6], 4294963136  ;;  %v1054_v0 = vmov 0   ;;  %v832_v1 = vld [vmem:[#allocation5 + $0xe4] ss:$16 sps:$4 sm:$0xff]   ;;  %v287_v34 = vlaneseq  ;;  %s701_s20 = sshll.u32 %s1200_s26, 4 }
  0x4d   : > { %505 = vmatprep.mubr.bf16.mxu0 %v1054_v0  ;;  %548 = vmatprep.mubr.bf16.mxu1 %v1054_v0  ;;  %v834_v2 = vld [vmem:[#allocation5 + $0xec] ss:$16 sps:$4 sm:$0xff]   ;;  %v836_v3 = vld [vmem:[#allocation5 + $0xe0] ss:$16 sps:$4 sm:$0xff]   ;;  %v837_v4 = vld [vmem:[#allocation5 + $0xe8] ss:$16 sps:$4 sm:$0xff]  }
  0x4e   : > { %473 = vmatprep.subr.bf16.mxu0 %v832_v1  ;;  %516 = vmatprep.subr.bf16.mxu1 %v834_v2  ;;  %v838_v5 = vld [vmem:[#allocation5 + $0xc4] ss:$16 sps:$4 sm:$0xff]   ;;  %v840_v6 = vld [vmem:[#allocation5 + $0xcc] ss:$16 sps:$4 sm:$0xff]   ;;  %v842_v7 = vld [vmem:[#allocation5 + $0xc0] ss:$16 sps:$4 sm:$0xff]  }
  0x4f   : > { %474 = vmatpush1.bf16.msra.mxu0 %v836_v3  ;;  %517 = vmatpush1.bf16.msra.mxu1 %v837_v4  ;;  %v843_v8 = vld [vmem:[#allocation5 + $0xc8] ss:$16 sps:$4 sm:$0xff]   ;;  %v844_v9 = vld [vmem:[#allocation5 + $0xa4] ss:$16 sps:$4 sm:$0xff]   ;;  %v846_v10 = vld [vmem:[#allocation5 + $0xac] ss:$16 sps:$4 sm:$0xff]  }
  0x50   : > { %475 = vmatprep.subr.bf16.mxu0 %v838_v5  ;;  %518 = vmatprep.subr.bf16.mxu1 %v840_v6  ;;  %v848_v11 = vld [vmem:[#allocation5 + $0xa0] ss:$16 sps:$4 sm:$0xff]   ;;  %v849_v12 = vld [vmem:[#allocation5 + $0xa8] ss:$16 sps:$4 sm:$0xff]   ;;  %v850_v13 = vld [vmem:[#allocation5 + $0x84] ss:$16 sps:$4 sm:$0xff]  }
  0x51   : > { %v852_v14 = vld [vmem:[#allocation5 + $0x8c] ss:$16 sps:$4 sm:$0xff]   ;;  %v854_v15 = vld [vmem:[#allocation5 + $0x80] ss:$16 sps:$4 sm:$0xff]   ;;  %v855_v16 = vld [vmem:[#allocation5 + $0x88] ss:$16 sps:$4 sm:$0xff]  }
  0x52   : > { %v856_v17 = vld [vmem:[#allocation5 + $0x64] ss:$16 sps:$4 sm:$0xff]   ;;  %v858_v18 = vld [vmem:[#allocation5 + $0x6c] ss:$16 sps:$4 sm:$0xff]   ;;  %v860_v19 = vld [vmem:[#allocation5 + $0x60] ss:$16 sps:$4 sm:$0xff]  }
  0x53   : > { %476 = vmatpush1.bf16.msra.mxu0 %v842_v7  ;;  %519 = vmatpush1.bf16.msra.mxu1 %v843_v8  ;;  %v861_v20 = vld [vmem:[#allocation5 + $0x68] ss:$16 sps:$4 sm:$0xff]   ;;  %v862_v21 = vld [vmem:[#allocation5 + $0x44] ss:$16 sps:$4 sm:$0xff]   ;;  %v864_v22 = vld [vmem:[#allocation5 + $0x4c] ss:$16 sps:$4 sm:$0xff]  }
  0x54   : > { %477 = vmatprep.subr.bf16.mxu0 %v844_v9  ;;  %520 = vmatprep.subr.bf16.mxu1 %v846_v10  ;;  %v866_v23 = vld [vmem:[#allocation5 + $0x40] ss:$16 sps:$4 sm:$0xff]   ;;  %v867_v24 = vld [vmem:[#allocation5 + $0x48] ss:$16 sps:$4 sm:$0xff]   ;;  %v868_v25 = vld [vmem:[#allocation5 + $0x24] ss:$16 sps:$4 sm:$0xff]  }
  0x55   : > { %v870_v26 = vld [vmem:[#allocation5 + $0x2c] ss:$16 sps:$4 sm:$0xff]   ;;  %v872_v27 = vld [vmem:[#allocation5 + $0x20] ss:$16 sps:$4 sm:$0xff]   ;;  %v873_v28 = vld [vmem:[#allocation5 + $0x28] ss:$16 sps:$4 sm:$0xff]  }
  0x56   : > { %v874_v29 = vld [vmem:[#allocation5 + $0x4] ss:$16 sps:$4 sm:$0xff]   ;;  %v876_v30 = vld [vmem:[#allocation5 + $0xc] ss:$16 sps:$4 sm:$0xff]   ;;  %v878_v31 = vld [vmem:[#allocation5] ss:$16 sps:$4 sm:$0xff]  }
  0x57   : > { %478 = vmatpush1.bf16.msra.mxu0 %v848_v11  ;;  %521 = vmatpush1.bf16.msra.mxu1 %v849_v12  ;;  %v879_v32 = vld [vmem:[#allocation5 + $0x8] ss:$16 sps:$4 sm:$0xff]   ;;  %v288_v35 = vshrl.u32 %v287_v34, 7  ;;  %v285_v39 = vld [vmem:[#allocation7] sm:$0xf]  ;;  %s245_s22 = scalar_lea.vmem [#allocation8], %s701_s20 }
  0x58   : > { %479 = vmatprep.subr.bf16.mxu0 %v850_v13  ;;  %522 = vmatprep.subr.bf16.mxu1 %v852_v14  ;;  %v880_v33 = vld [vmem:[%s1204_s6] sm:$0xff]   ;;  %s582_s24 = sshll.u32 %s245_s22, 4  ;;  %s741_s5 = sshll.u32 %s1037_s15, 8  ;;  %s1217_s24 = int_to_ptr.vmem [resolvable:$true] %s582_s24 }
  0x59   : > { %v289_v36 = vsub.s32 0, %v288_v35  ;;  %v297_v37 = vsub.s32 2, %v288_v35  ;;  %v293_v38 = vsub.s32 1, %v288_v35  ;;  %v301_v43 = vsub.s32 3, %v288_v35  ;;  %s1222_s8 = scalar_lea.hbm %s1273_s3, %s741_s5  ;;  %s568_s9 = scalar_lea.sflag [#allocation4], %s1200_s26 }
  0x5a   : > { %s961_s10 = scalar_lea.vmem %s1217_s24, 256  ;;  %s1055_s15 = smov [#allocation8]  }
  0x5b   : > { %480 = vmatpush1.bf16.msra.mxu0 %v854_v15  ;;  %523 = vmatpush1.bf16.msra.mxu1 %v855_v16  ;;  %v290_v40 = vrot.slane %v285_v39, %v289_v36  ;;  %v298_v41 = vrot.slane %v285_v39, %v297_v37  ;;  %v294_v42 = vrot.slane %v285_v39, %v293_v38  ;;  %p962_p8 = scmp.ne.s32.totalorder %s1217_s24, %s961_s10  ;;  %s965_s18 = sshll.u32 %s1055_s15, 4  ;;  %s966_s18 = int_to_ptr.vmem [resolvable:$false] %s965_s18 }
  0x5c   : > { %481 = vmatprep.subr.bf16.mxu0 %v856_v17  ;;  %524 = vmatprep.subr.bf16.mxu1 %v858_v18  ;;  %v302_v51 = vrot.slane %v285_v39, %v301_v43  ;;  %s967_s25 = scalar_lea.vmem %s966_s18, 512  ;;  %p968_p2 = scmp.lt.s32.totalorder %s1217_s24, %s966_s18 }
  0x5d   : > { %p963_p9 = pnand %p962_p8, %p1173_p7  ;;  %p969_p13 = scmp.lt.s32.totalorder %s967_s25, %s961_s10 }
  0x5f   : > { %482 = vmatpush1.bf16.msra.mxu0 %v860_v19  ;;  %525 = vmatpush1.bf16.msra.mxu1 %v861_v20  ;;  %p964_p11 = pneg %p963_p9  ;;  %p970_p0 = por %p969_p13, %p968_p2 }
  0x60   : > { %483 = vmatprep.subr.bf16.mxu0 %v862_v21  ;;  %526 = vmatprep.subr.bf16.mxu1 %v864_v22 }
  0x61   : > { %p971_p5 = pnand %p970_p0, %p964_p11 }
  0x63   : > { %484 = vmatpush1.bf16.msra.mxu0 %v866_v23  ;;  %527 = vmatpush1.bf16.msra.mxu1 %v867_v24 }
  0x64   : > { %485 = vmatprep.subr.bf16.mxu0 %v868_v25  ;;  %528 = vmatprep.subr.bf16.mxu1 %v870_v26 }
  0x67   : > { %486 = vmatpush1.bf16.msra.mxu0 %v872_v27  ;;  %529 = vmatpush1.bf16.msra.mxu1 %v873_v28 }
  0x68   : > { %487 = vmatprep.subr.bf16.mxu0 %v874_v29  ;;  %530 = vmatprep.subr.bf16.mxu1 %v876_v30 }
  0x6b   : > { %488 = vmatpush1.bf16.msra.mxu0 %v878_v31  ;;  %531 = vmatpush1.bf16.msra.mxu1 %v879_v32 }
  0x6e   : > { %506 = vmatmul.mubr.bf16.vlgmr.msra.gmra.mxu0 %v880_v33  ;;  %549 = vmatmul.mubr.bf16.vlgmr.msra.gmra.mxu1 %v880_v33 }
 0x12e   : > { %v507_v44 = vpop.f32.mrf.mxu0  ;;  %v550_v45 = vpop.f32.mrf.mxu1 }
 0x12f   : > { %v508_v48 = vadd.f32 %v507_v44, %v290_v40  ;;  %v551_v49 = vadd.f32 %v550_v45, %v298_v41 }
 0x130   : > { %v509_v46 = vpop.f32.mrf.mxu0  ;;  %v552_v47 = vpop.f32.mrf.mxu1 }
 0x131   : > { %v510_v50 = vadd.f32 %v509_v46, %v294_v42  ;;  %v553_v56 = vadd.f32 %v552_v47, %v302_v51 }
 0x132   : > { %v511_v52 = vpop.f32.mrf.mxu0  ;;  %v554_v53 = vpop.f32.mrf.mxu1 }
 0x133   : > { %v559_v54 = vmax.f32 %v508_v48, %v510_v50  ;;  %v512_v58 = vadd.f32 %v511_v52, %v290_v40  ;;  %v555_v62 = vadd.f32 %v554_v53, %v298_v41 }
 0x134   : > { %v513_v55 = vpop.f32.mrf.mxu0  ;;  %v556_v60 = vpop.f32.mrf.mxu1 }
 0x135   : > { %v561_v57 = vmax.f32 %v559_v54, %v551_v49  ;;  %v514_v59 = vadd.f32 %v513_v55, %v294_v42  ;;  %v557_v0 = vadd.f32 %v556_v60, %v302_v51 }
 0x137   : > { %v563_v61 = vmax.f32 %v561_v57, %v553_v56  ;;  %v560_v63 = vmax.f32 %v512_v58, %v514_v59 }
 0x139   : > { %565 = vst [vmem:[%s245_s22] sm:$0xff] %v563_v61  ;;  %v562_v1 = vmax.f32 %v560_v63, %v555_v62 }
 0x13b   : > { %v564_v2 = vmax.f32 %v562_v1, %v557_v0 }
 0x13d   : > { %566 = vst [vmem:[%s245_s22 + $0x8] sm:$0xff] %v564_v2 }
 0x13e   : > { %974 = shalt.err (!%p971_p5)
}
 0x13f   : > { %s975_s27 = scalar_lea.hbm %s1222_s8, 256  ;;  %s979_s4 = scalar_lea.hbm %s1273_s3, 512 }
 0x140   : > { %p976_p10 = scmp.ne.s32.totalorder %s1222_s8, %s975_s27  ;;  %p980_p6 = scmp.lt.s32.totalorder %s1222_s8, %s1273_s3 }
 0x141   : > { %p981_p12 = scmp.lt.s32.totalorder %s979_s4, %s975_s27 }
 0x142   : > { %p977_p1 = pnand %p976_p10, %p1173_p7 }
 0x143   : > { %p982_p3 = por %p981_p12, %p980_p6 }
 0x144   : > { %p978_p4 = pneg %p977_p1 }
 0x146   : > { %p983_p8 = pnand %p982_p3, %p978_p4 }
 0x148   : > { %986 = shalt.err (!%p983_p8)
}
 0x149   : > { %s1056_s22 = smov 128   ;;  %s1057_s5 = smov 8  }
 0x14a   : > { %752 = dma.vmem_to_hbm [thread:$0]  (%p1173_p7), %s1217_s24, 256, %s1222_s8, %s568_s9, %s1056_s22, %s1056_s22, %s1057_s5  }
 0x14b PF: > { %s597_s7 = sand.u32 1, %s1025_s12   ;;  %p1287_p9 = scmp.ne.s32.totalorder %s1280_s23, 0 }
 0x14c   : > { %p1288_p11 = scmp.ge.s32.totalorder %s1045_s17, 2  ;;  %s598_s21 = scalar_lea.sflag [#allocation4], %s597_s7 }
 0x14e   : > { %p766_p2 = pnand %p1288_p11, %p1287_p9 }
 0x150   : > { %p767_p13 = pneg %p766_p2 }
 0x152   : > { %1020 = dma.done.wait (%p767_p13), %s598_s21, 256  }
 0x153   : > { %1022 = vsyncadd (%p767_p13), %s598_s21, 4294967040  ;;  %s20_s17 = sadd.s32 1, %s1045_s17   ;;  %s1289_s12 = smov %s1029_s13 }
 0x154   : > { %p17_p0 = scmp.ge.s32.totalorder %s20_s17, 4   ;;  %s1290_s13 = smov %s1033_s14 }
 0x155   : > { %s1291_s14 = smov %s1182_s29  ;;  %s1292_s15 = smov %s1041_s16 }
 0x156   : > { %s1293_s16 = smov %s1295_s11  ;;  %19 = sbr.rel (!%p17_p0) target bundleno = 7 (0x7), region = 87 }
 0x15b   :  { %603 = vsyncpa [#allocation3], 1 }
 0x15c   :  { %605 = vsyncpa [#allocation3 + $0x1], 1 }
 0x15d   :  { %606 = vsyncpa [#allocation6], 1 }
 0x15e   :  { %607 = vsyncpa [#allocation4], 1 }
 0x15f   :  { %609 = vsyncpa [#allocation4 + $0x1], 1 }

</bundles_post_ra>
